<compile_context>
chip_gen: v7x
topology: tpu7x:2x2x1
jax: 0.10.0
libtpu: 0.0.40
codegen_flags: <defaults>
</compile_context>

<pallas_src>
import functools

import jax
import jax.numpy as jnp
from jax import lax
from jax.experimental import pallas as pl
from jax.experimental.pallas import tpu as pltpu


def _round_up(n, m):
    return ((n + m - 1) // m) * m


# ----------------------------------------------------------------------------
# Kernels
# ----------------------------------------------------------------------------
def gru_ode_cell_kernel(h_ref, w_rz_ref, w_n_ref, dh_ref):
    """dh = (1 - z) * (g - h) for one (TB, Hp) batch tile."""
    hp = h_ref.shape[1]
    h = h_ref[...].astype(jnp.float32)
    # One fused MXU dot: [TB, Hp] @ [Hp, 2Hp] = [pre_r | pre_z]; bf16 in, f32 acc.
    rz = jax.nn.sigmoid(
        jnp.dot(h.astype(jnp.bfloat16), w_rz_ref[...],
                preferred_element_type=jnp.float32))
    r = rz[:, :hp]          # lane-aligned split (hp is a multiple of 128)
    z = rz[:, hp:]
    # Second dot data-depends on r, so it cannot be fused with the first.
    g = jnp.tanh(
        jnp.dot((r * h).astype(jnp.bfloat16), w_n_ref[...],
                preferred_element_type=jnp.float32))
    dh_ref[...] = ((1.0 - z) * (g - h)).astype(dh_ref.dtype)


def gru_ode_euler_kernel(h0_ref, w_rz_ref, w_n_ref, h_out_ref, *, num_steps, dt):
    """num_steps explicit-Euler steps fully inside one kernel (per batch tile).

    Weight refs are read inside the loop body (VMEM loads, 3 vld slots/cycle) instead
    of being hoisted into vregs before the loop, so only h / rz / g live in the
    64-vreg file and the loop stays MXU-bound rather than spill-bound.
    """
    hp = h0_ref.shape[1]

    def step(_, h):
        rz = jax.nn.sigmoid(
            jnp.dot(h.astype(jnp.bfloat16), w_rz_ref[...],
                    preferred_element_type=jnp.float32))
        r = rz[:, :hp]
        z = rz[:, hp:]
        g = jnp.tanh(
            jnp.dot((r * h).astype(jnp.bfloat16), w_n_ref[...],
                    preferred_element_type=jnp.float32))
        return h + dt * (1.0 - z) * (g - h)

    h0 = h0_ref[...].astype(jnp.float32)
    h_out_ref[...] = lax.fori_loop(0, num_steps, step, h0,
                                   unroll=2).astype(h_out_ref.dtype)


# ----------------------------------------------------------------------------
# Parameter preparation (one-time, OUT of the hot path)
# ----------------------------------------------------------------------------
def init_params(key, hidden_size):
    """nn.Linear-style uniform(-1/sqrt(fan_in), +1/sqrt(fan_in)) init, no biases."""
    ks = jax.random.split(key, 3)
    lim = 1.0 / jnp.sqrt(hidden_size)
    u = lambda k: jax.random.uniform(
        k, (hidden_size, hidden_size), jnp.float32, minval=-lim, maxval=lim)
    return {"lin_hr_w": u(ks[0]), "lin_hz_w": u(ks[1]), "lin_hn_w": u(ks[2])}


def prepare_params(params, compute_dtype=jnp.bfloat16):
    """PyTorch Linear stores (out, in); kernel wants (in, out) for h @ W.

    Whr / Whz are fused into a single [Hp, 2Hp] matrix (one MXU dot for r and z),
    everything is zero-padded to Hp = multiple of 128 (lane-dense) and cast to bf16.
    Zero padding guarantees padded lanes of h stay exactly 0 through the update.
    """
    H = params["lin_hr_w"].shape[0]
    Hp = _round_up(H, 128)

    def prep_w(w):  # (out, in) -> zero-padded (in, out)
        wt = w.astype(jnp.float32).T
        return jnp.pad(wt, ((0, Hp - H), (0, Hp - H)))

    w_rz = jnp.concatenate(
        [prep_w(params["lin_hr_w"]), prep_w(params["lin_hz_w"])], axis=1)  # [Hp, 2Hp]
    return {
        "w_rz": w_rz.astype(compute_dtype),
        "w_n": prep_w(params["lin_hn_w"]).astype(compute_dtype),           # [Hp, Hp]
        "H": H,
        "Hp": Hp,
    }


# ----------------------------------------------------------------------------
# Wrappers
# ----------------------------------------------------------------------------
def _tiling(batch, batch_tile):
    bp = _round_up(batch, 8)
    tb = min(batch_tile, bp)
    return _round_up(bp, tb), tb


def _pad_h(h, bp, hp):
    b, hh = h.shape
    h = h.astype(jnp.float32)
    if b == bp and hh == hp:
        return h
    return jnp.pad(h, ((0, bp - b), (0, hp - hh)))


def _vmem_limit_bytes(tb, hp, prep):
    w_bytes = (prep["w_rz"].size + prep["w_n"].size) * prep["w_rz"].dtype.itemsize
    # resident weights (x2 buffers) + double-buffered h/out tiles + activation slack.
    need = 2 * w_bytes + 4 * tb * hp * 4 + 6 * tb * 2 * hp * 4
    # Cap at 64 MiB (v7x physical per-core VMEM); v5e/v6e have 128 MiB headroom.
    return int(min(max(need, 32 << 20), 64 << 20))


def _specs(tb, hp):
    in_specs = [
        pl.BlockSpec((tb, hp), lambda i: (i, 0)),        # h tile (pipelined)
        pl.BlockSpec((hp, 2 * hp), lambda i: (0, 0)),    # w_rz, VMEM-resident
        pl.BlockSpec((hp, hp), lambda i: (0, 0)),        # w_n, VMEM-resident
    ]
    out_specs = pl.BlockSpec((tb, hp), lambda i: (i, 0))
    return in_specs, out_specs


def gru_ode_cell_forward(t, h, prep, *, batch_tile=256):
    """forward(t, h) -> dh.  `t` accepted for parity with the spec but unused."""
    del t
    B, H = h.shape
    Hp = prep["Hp"]
    Bp, TB = _tiling(B, batch_tile)
    h_p = _pad_h(h, Bp, Hp)
    in_specs, out_specs = _specs(TB, Hp)

    dh_p = pl.pallas_call(
        gru_ode_cell_kernel,
        out_shape=jax.ShapeDtypeStruct((Bp, Hp), jnp.float32),
        grid_spec=pltpu.PrefetchScalarGridSpec(
            num_scalar_prefetch=0,
            grid=(Bp // TB,),
            in_specs=in_specs,
            out_specs=out_specs,
        ),
        compiler_params=pltpu.CompilerParams(
            dimension_semantics=("parallel",),
            vmem_limit_bytes=_vmem_limit_bytes(TB, Hp, prep),
        ),
    )(h_p, prep["w_rz"], prep["w_n"])
    return dh_p[:B, :H]


def gru_ode_euler_forward(h0, prep, *, num_steps, dt, batch_tile=256):
    """h(T) after num_steps Euler steps of size dt, time loop fused in one kernel."""
    B, H = h0.shape
    Hp = prep["Hp"]
    Bp, TB = _tiling(B, batch_tile)
    h_p = _pad_h(h0, Bp, Hp)
    in_specs, out_specs = _specs(TB, Hp)

    kernel = functools.partial(gru_ode_euler_kernel,
                               num_steps=int(num_steps), dt=float(dt))
    w_bytes = (prep["w_rz"].size + prep["w_n"].size) * prep["w_rz"].dtype.itemsize
    cost = pl.CostEstimate(
        flops=int(num_steps) * 6 * Bp * Hp * Hp,
        transcendentals=int(num_steps) * 3 * Bp * Hp,
        bytes_accessed=2 * Bp * Hp * 4 + w_bytes,
    )

    hT_p = pl.pallas_call(
        kernel,
        out_shape=jax.ShapeDtypeStruct((Bp, Hp), jnp.float32),
        grid_spec=pltpu.PrefetchScalarGridSpec(
            num_scalar_prefetch=0,
            grid=(Bp // TB,),
            in_specs=in_specs,
            out_specs=out_specs,
        ),
        compiler_params=pltpu.CompilerParams(
            dimension_semantics=("parallel",),
            vmem_limit_bytes=_vmem_limit_bytes(TB, Hp, prep),
        ),
        input_output_aliases={0: 0},   # reuse the padded h0 buffer for the output
        cost_estimate=cost,
    )(h_p, prep["w_rz"], prep["w_n"])
    return hT_p[:B, :H]


# ----------------------------------------------------------------------------
# Pure-JAX reference (matches the PyTorch forward exactly)
# ----------------------------------------------------------------------------
def gru_ode_cell_ref(t, h, params):
    del t
    r = jax.nn.sigmoid(h @ params["lin_hr_w"].T)
    z = jax.nn.sigmoid(h @ params["lin_hz_w"].T)
    g = jnp.tanh((r * h) @ params["lin_hn_w"].T)
    return (1.0 - z) * (g - h)


def euler_ref(h0, params, num_steps, dt):
    h = h0
    for _ in range(num_steps):
        h = h + dt * gru_ode_cell_ref(0.0, h, params)
    return h


# ----------------------------------------------------------------------------
# Demo / self-test
# ----------------------------------------------------------------------------
if __name__ == "__main__":
    key = jax.random.PRNGKey(0)
    k_param, k_h = jax.random.split(key, 2)

    batch, hidden_size = 8, 32
    num_steps, dt = 16, 0.1

    params = init_params(k_param, hidden_size)
    prep = prepare_params(params)          # transpose/fuse/pad/bf16-cast, done once
    h = jax.random.normal(k_h, (batch, hidden_size), jnp.float32)

    # 1) Single derivative evaluation (the module's forward).
    dh = jax.block_until_ready(gru_ode_cell_forward(0.0, h, prep))
    dh_ref = gru_ode_cell_ref(0.0, h, params)
    assert dh.shape == (batch, hidden_size)
    # bf16 matmul operands -> looser tolerance than pure-f32 (accumulation is f32).
    assert jnp.allclose(dh, dh_ref, atol=2e-2, rtol=2e-2), "dh mismatch vs reference"

    # 2) Fused multi-step Euler solve (time loop inside one pallas_call).
    hT = jax.block_until_ready(
        gru_ode_euler_forward(h, prep, num_steps=num_steps, dt=dt))
    hT_ref = euler_ref(h, params, num_steps, dt)
    assert hT.shape == (batch, hidden_size)
    assert jnp.allclose(hT, hT_ref, atol=5e-2, rtol=5e-2), "Euler mismatch vs reference"

    print("KERNEL_OK")
</pallas_src>

<mosaic_0001>
module attributes {stable_mosaic.version = 11 : i64} {
  func.func @gru_ode_cell_kernel(%arg0: i32, %arg1: memref<8x128xf32, #tpu.memory_space<vmem>>, %arg2: memref<128x256xbf16, #tpu.memory_space<vmem>>, %arg3: memref<128x128xbf16, #tpu.memory_space<vmem>>, %arg4: memref<8x128xf32, #tpu.memory_space<vmem>>) attributes {dimension_semantics = [#tpu.dimension_semantics<parallel>], iteration_bounds = array<i64: 1>, scalar_prefetch = 0 : i64, scratch_operands = 0 : i64, tpu.core_type = #tpu.core_type<tc>, window_params = [{transform_indices = @transform_0, window_bounds = array<i64: 8, 128>}, {pipeline_mode = #tpu.pipeline_mode<synchronous>, transform_indices = @transform_1, window_bounds = array<i64: 128, 256>}, {pipeline_mode = #tpu.pipeline_mode<synchronous>, transform_indices = @transform_2, window_bounds = array<i64: 128, 128>}, {transform_indices = @transform_3, window_bounds = array<i64: 8, 128>}]} {
    %c0 = arith.constant 0 : index
    %c0_0 = arith.constant 0 : index
    %0 = vector.load %arg1[%c0, %c0_0] : memref<8x128xf32, #tpu.memory_space<vmem>>, vector<8x128xf32>
    %1 = arith.truncf %0 : vector<8x128xf32> to vector<8x128xbf16>
    %c0_1 = arith.constant 0 : index
    %c0_2 = arith.constant 0 : index
    %2 = vector.load %arg2[%c0_1, %c0_2] : memref<128x256xbf16, #tpu.memory_space<vmem>>, vector<128x256xbf16>
    %cst = arith.constant dense<0.000000e+00> : vector<8x256xf32>
    %3 = tpu.matmul %1, %2, %cst {dimension_numbers = #tpu.dot_dimension_numbers<[1], [0], [0], [1], [0, 0, 1, 1], [], []>} : vector<8x128xbf16>, vector<128x256xbf16>, vector<8x256xf32> -> vector<8x256xf32>
    %4 = arith.negf %3 : vector<8x256xf32>
    %5 = math.exp %4 : vector<8x256xf32>
    %cst_3 = arith.constant 1.000000e+00 : f32
    %6 = vector.broadcast %cst_3 : f32 to vector<8x256xf32>
    %7 = arith.addf %6, %5 : vector<8x256xf32>
    %8 = arith.divf %6, %7 : vector<8x256xf32>
    %9 = vector.extract_strided_slice %8 {offsets = [0, 0], sizes = [8, 128], strides = [1, 1]} : vector<8x256xf32> to vector<8x128xf32>
    %10 = vector.extract_strided_slice %8 {offsets = [0, 128], sizes = [8, 128], strides = [1, 1]} : vector<8x256xf32> to vector<8x128xf32>
    %11 = arith.mulf %9, %0 : vector<8x128xf32>
    %12 = arith.truncf %11 : vector<8x128xf32> to vector<8x128xbf16>
    %c0_4 = arith.constant 0 : index
    %c0_5 = arith.constant 0 : index
    %13 = vector.load %arg3[%c0_4, %c0_5] : memref<128x128xbf16, #tpu.memory_space<vmem>>, vector<128x128xbf16>
    %cst_6 = arith.constant dense<0.000000e+00> : vector<8x128xf32>
    %14 = tpu.matmul %12, %13, %cst_6 {dimension_numbers = #tpu.dot_dimension_numbers<[1], [0], [0], [1], [0, 0, 1, 1], [], []>} : vector<8x128xbf16>, vector<128x128xbf16>, vector<8x128xf32> -> vector<8x128xf32>
    %15 = math.tanh %14 : vector<8x128xf32>
    %cst_7 = arith.constant 1.000000e+00 : f32
    %16 = vector.broadcast %cst_7 : f32 to vector<8x128xf32>
    %17 = arith.subf %16, %10 : vector<8x128xf32>
    %18 = arith.subf %15, %0 : vector<8x128xf32>
    %19 = arith.mulf %17, %18 : vector<8x128xf32>
    %c0_8 = arith.constant 0 : index
    %c0_9 = arith.constant 0 : index
    %20 = vector.load %arg4[%c0_8, %c0_9] : memref<8x128xf32, #tpu.memory_space<vmem>>, vector<8x128xf32>
    tpu.vector_store %arg4[%c0_8, %c0_9], %19 {strides = array<i32>} : memref<8x128xf32, #tpu.memory_space<vmem>>, vector<8x128xf32>,
    return
  }
  func.func @transform_0(%arg0: i32) -> (i32, i32) {
    %c0_i32 = arith.constant 0 : i32
    %c0_i32_0 = arith.constant 0 : i32
    return %arg0, %c0_i32 : i32, i32
  }
  func.func @transform_1(%arg0: i32) -> (i32, i32) {
    %c0_i32 = arith.constant 0 : i32
    %c0_i32_0 = arith.constant 0 : i32
    %c0_i32_1 = arith.constant 0 : i32
    return %c0_i32, %c0_i32_0 : i32, i32
  }
  func.func @transform_2(%arg0: i32) -> (i32, i32) {
    %c0_i32 = arith.constant 0 : i32
    %c0_i32_0 = arith.constant 0 : i32
    %c0_i32_1 = arith.constant 0 : i32
    return %c0_i32, %c0_i32_0 : i32, i32
  }
  func.func @transform_3(%arg0: i32) -> (i32, i32) {
    %c0_i32 = arith.constant 0 : i32
    %c0_i32_0 = arith.constant 0 : i32
    return %arg0, %c0_i32 : i32, i32
  }
}

</mosaic_0001>

<bundles_post_ra>
// kernel: tpu_custom_call.1
= control target key start
LH: loop header
LB: loop body
LE: loop exit
PB: predicated region body
PF: predicated region fallthrough
CT: control target
= control target key end

     0   :  { %8 = vsyncpa [#allocation3], 0  ;;  %s614_s0 = inlined_call_operand.hbm [shape: f32[8,128], index: 0, kind: input, shape index: {}]   ;;  %s615_s1 = inlined_call_operand.hbm [shape: bf16[128,256], index: 1, kind: input, shape index: {}]   ;;  %s616_s2 = inlined_call_operand.hbm [shape: bf16[128,128], index: 2, kind: input, shape index: {}]   ;;  %s617_s3 = inlined_call_operand.hbm [shape: f32[8,128], index: 3, kind: output, shape index: {}]  }
   0x1   :  { %9 = vsyncpa [#allocation6], 0 }
   0x2   :  { %10 = vsyncpa [#allocation4], 0  ;;  %s535_s12 = smov [#allocation5]   ;;  %s441_s16 = scalar_lea.hbm %s615_s1, 2048 }
   0x3   :  { %s26_s13 = sshll.u32 %s535_s12, 4  ;;  %p442_p0 = scmp.ne.s32.totalorder %s615_s1, %s441_s16  ;;  %s27_s13 = int_to_ptr.vmem [resolvable:$true] %s26_s13 }
   0x4   :  { %p445_p1 = scmp.lt.u32.totalorder %s441_s16, %s615_s1 }
   0x6   :  { %p447_p2 = pnand %p445_p1, %p442_p0 }
   0x8   :  { %450 = shalt.err (!%p447_p2)
}
   0x9   :  { %s451_s21 = scalar_lea.vmem %s27_s13, 2048  ;;  %p456_p4 = scmp.lt.s32.totalorder %s27_s13, %s27_s13 }
   0xa   :  { %p452_p3 = scmp.ne.s32.totalorder %s27_s13, %s451_s21  ;;  %p457_p5 = scmp.lt.s32.totalorder %s451_s21, %s451_s21 }
   0xc   :  { %p458_p6 = por %p457_p5, %p456_p4 }
   0xe   :  { %p459_p7 = pnand %p458_p6, %p452_p3 }
  0x10   :  { %462 = shalt.err (!%p459_p7)
}
  0x11   :  { %s536_s22 = smov 128   ;;  %s537_s23 = smov 8  }
  0x12   :  { %32 = dma.hbm_to_vmem [thread:$0]  %s615_s1, 2048, %s27_s13, [#allocation6], %s536_s22, %s536_s22, %s537_s23  }
  0x13   :  { %s538_s26 = smov [#allocation2]   ;;  %s539_s28 = smov [#allocation7]  }
  0x14   :  { %s17_s27 = sshll.u32 %s538_s26, 4  ;;  %s38_s29 = sshll.u32 %s539_s28, 4  ;;  %s18_s27 = int_to_ptr.vmem [resolvable:$true] %s17_s27  ;;  %s39_s29 = int_to_ptr.vmem [resolvable:$true] %s38_s29 }
  0x15   :  { %s463_s5 = scalar_lea.hbm %s614_s0, 128 }
  0x16   :  { %p464_p8 = scmp.ne.s32.totalorder %s614_s0, %s463_s5  ;;  %p467_p9 = scmp.lt.u32.totalorder %s463_s5, %s614_s0 }
  0x18   :  { %p469_p10 = pnand %p467_p9, %p464_p8 }
  0x1a   :  { %472 = shalt.err (!%p469_p10)
}
  0x1b   :  { %s473_s1 = scalar_lea.vmem %s18_s27, 128  ;;  %p478_p12 = scmp.lt.s32.totalorder %s18_s27, %s18_s27 }
  0x1c   :  { %p474_p11 = scmp.ne.s32.totalorder %s18_s27, %s473_s1  ;;  %p479_p13 = scmp.lt.s32.totalorder %s473_s1, %s473_s1 }
  0x1e   :  { %p480_p0 = por %p479_p13, %p478_p12 }
  0x20   :  { %p481_p1 = pnand %p480_p0, %p474_p11 }
  0x22   :  { %484 = shalt.err (!%p481_p1)
}
  0x23   :  { %20 = dma.hbm_to_vmem [thread:$0]  %s614_s0, 128, %s18_s27, [#allocation3]  }
  0x24   :  { %s485_s14 = scalar_lea.hbm %s616_s2, 1024 }
  0x25   :  { %p486_p2 = scmp.ne.s32.totalorder %s616_s2, %s485_s14  ;;  %p489_p3 = scmp.lt.u32.totalorder %s485_s14, %s616_s2 }
  0x27   :  { %p491_p4 = pnand %p489_p3, %p486_p2 }
  0x29   :  { %494 = shalt.err (!%p491_p4)
}
  0x2a   :  { %s495_s19 = scalar_lea.vmem %s39_s29, 1024  ;;  %p500_p6 = scmp.lt.s32.totalorder %s39_s29, %s39_s29 }
  0x2b   :  { %p496_p5 = scmp.ne.s32.totalorder %s39_s29, %s495_s19  ;;  %p501_p7 = scmp.lt.s32.totalorder %s495_s19, %s495_s19 }
  0x2d   :  { %p502_p8 = por %p501_p7, %p500_p6 }
  0x2f   :  { %p503_p9 = pnand %p502_p8, %p496_p5 }
  0x31   :  { %506 = shalt.err (!%p503_p9)
}
  0x32   :  { %s540_s0 = smov 64   ;;  %s541_s20 = smov 4  }
  0x33   :  { %44 = dma.hbm_to_vmem [thread:$0]  %s616_s2, 1024, %s39_s29, [#allocation6], %s540_s0, %s540_s0, %s541_s20  }
  0x34   :  { %529 = dma.done.wait [#allocation3], 128  }
  0x35   :  { %530 = vsyncadd [#allocation3], 4294967168 }
  0x36   :  { %531 = dma.done.wait [#allocation6], 3072  }
  0x37   :  { %532 = vsyncadd [#allocation6], 4294964224  ;;  %v542_v0 = vmov 0   ;;  %v543_v1 = vmov 0.0   ;;  %v399_v2 = vld [vmem:[#allocation5 + $0x4] ss:$8 sps:$4 sm:$0xff]  }
  0x38   :  { %185 = vmatprep.mubr.bf16.mxu0 %v542_v0  ;;  %368 = vmatprep.subr.bf16.mxu1 %v543_v1  ;;  %v401_v3 = vld [vmem:[#allocation5] ss:$8 sps:$4 sm:$0xff]   ;;  %v402_v4 = vld [vmem:[#allocation5 + $0x14] ss:$8 sps:$4 sm:$0xff]   ;;  %v404_v5 = vld [vmem:[#allocation5 + $0x10] ss:$8 sps:$4 sm:$0xff]  }
  0x39   :  { %153 = vmatprep.subr.bf16.mxu0 %v399_v2  ;;  %v405_v6 = vld [vmem:[#allocation5 + $0x24] ss:$8 sps:$4 sm:$0xff]   ;;  %v407_v7 = vld [vmem:[#allocation5 + $0x20] ss:$8 sps:$4 sm:$0xff]   ;;  %v408_v8 = vld [vmem:[#allocation5 + $0x34] ss:$8 sps:$4 sm:$0xff]  }
  0x3a   :  { %154 = vmatpush1.bf16.msra.mxu0 %v401_v3  ;;  %v410_v9 = vld [vmem:[#allocation5 + $0x30] ss:$8 sps:$4 sm:$0xff]   ;;  %v411_v10 = vld [vmem:[#allocation5 + $0x44] ss:$8 sps:$4 sm:$0xff]   ;;  %v413_v11 = vld [vmem:[#allocation5 + $0x40] ss:$8 sps:$4 sm:$0xff]  }
  0x3b   :  { %155 = vmatprep.subr.bf16.mxu0 %v402_v4  ;;  %v414_v12 = vld [vmem:[#allocation5 + $0x54] ss:$8 sps:$4 sm:$0xff]   ;;  %v416_v13 = vld [vmem:[#allocation5 + $0x50] ss:$8 sps:$4 sm:$0xff]   ;;  %v417_v14 = vld [vmem:[#allocation5 + $0x64] ss:$8 sps:$4 sm:$0xff]  }
  0x3c   :  { %v419_v15 = vld [vmem:[#allocation5 + $0x60] ss:$8 sps:$4 sm:$0xff]   ;;  %v420_v16 = vld [vmem:[#allocation5 + $0x74] ss:$8 sps:$4 sm:$0xff]   ;;  %v422_v17 = vld [vmem:[#allocation5 + $0x70] ss:$8 sps:$4 sm:$0xff]  }
  0x3d   :  { %v55_v18 = vld [vmem:[#allocation2] sm:$0xff]  ;;  %v423_v20 = vld [vmem:[#allocation7] sm:$0xff]   ;;  %v424_v21 = vld [vmem:[#allocation7 + $0x8] sm:$0xff]   ;;  %vm544_vm0 = vmmov 0   ;;  %s545_s2 = smov [#allocation8]  }
  0x3e   :  { %156 = vmatpush1.bf16.msra.mxu0 %v404_v5  ;;  %v56_v19 = vpack.c.bf16 %v55_v18, %v55_v18  ;;  %369 = vmatpush3.bf16.msra.mxu1 %v423_v20  ;;  %v425_v22 = vld [vmem:[#allocation7 + $0x10] sm:$0xff]   ;;  %v426_v23 = vld [vmem:[#allocation7 + $0x18] sm:$0xff]   ;;  %v427_v24 = vld [vmem:[#allocation7 + $0x20] sm:$0xff]   ;;  %s323_s23 = sshll.u32 %s545_s2, 4  ;;  %s324_s23 = int_to_ptr.vmem [resolvable:$true] %s323_s23 }
  0x3f   :  { %157 = vmatprep.subr.bf16.mxu0 %v405_v6  ;;  %370 = vmatprep.subr.bf16.mxu1 %v543_v1  ;;  %v428_v25 = vld [vmem:[#allocation7 + $0x28] sm:$0xff]   ;;  %v429_v26 = vld [vmem:[#allocation7 + $0x30] sm:$0xff]   ;;  %v430_v27 = vld [vmem:[#allocation7 + $0x38] sm:$0xff]   ;;  %s507_s24 = scalar_lea.vmem %s324_s23, 128  ;;  %p512_p11 = scmp.lt.s32.totalorder %s324_s23, %s324_s23 }
  0x40   :  { %384 = vmatprep.mubr.msk.bf16.mxu1 %vm544_vm0, %v543_v1  ;;  %p508_p10 = scmp.ne.s32.totalorder %s324_s23, %s507_s24  ;;  %p513_p12 = scmp.lt.s32.totalorder %s507_s24, %s507_s24 }
  0x42   :  { %158 = vmatpush1.bf16.msra.mxu0 %v407_v7  ;;  %371 = vmatpush3.bf16.msra.mxu1 %v424_v21  ;;  %p514_p13 = por %p513_p12, %p512_p11 }
  0x43   :  { %159 = vmatprep.subr.bf16.mxu0 %v408_v8  ;;  %372 = vmatprep.subr.bf16.mxu1 %v543_v1 }
  0x44   :  { %p515_p0 = pnand %p514_p13, %p508_p10 }
  0x46   :  { %160 = vmatpush1.bf16.msra.mxu0 %v410_v9  ;;  %373 = vmatpush3.bf16.msra.mxu1 %v425_v22 }
  0x47   :  { %161 = vmatprep.subr.bf16.mxu0 %v411_v10  ;;  %374 = vmatprep.subr.bf16.mxu1 %v543_v1 }
  0x4a   :  { %162 = vmatpush1.bf16.msra.mxu0 %v413_v11  ;;  %375 = vmatpush3.bf16.msra.mxu1 %v426_v23 }
  0x4b   :  { %163 = vmatprep.subr.bf16.mxu0 %v414_v12  ;;  %376 = vmatprep.subr.bf16.mxu1 %v543_v1 }
  0x4e   :  { %164 = vmatpush1.bf16.msra.mxu0 %v416_v13  ;;  %377 = vmatpush3.bf16.msra.mxu1 %v427_v24 }
  0x4f   :  { %165 = vmatprep.subr.bf16.mxu0 %v417_v14  ;;  %378 = vmatprep.subr.bf16.mxu1 %v543_v1 }
  0x52   :  { %166 = vmatpush1.bf16.msra.mxu0 %v419_v15  ;;  %379 = vmatpush3.bf16.msra.mxu1 %v428_v25 }
  0x53   :  { %167 = vmatprep.subr.bf16.mxu0 %v420_v16  ;;  %380 = vmatprep.subr.bf16.mxu1 %v543_v1 }
  0x56   :  { %168 = vmatpush1.bf16.msra.mxu0 %v422_v17  ;;  %381 = vmatpush3.bf16.msra.mxu1 %v429_v26 }
  0x57   :  { %382 = vmatprep.subr.bf16.mxu1 %v543_v1 }
  0x59   :  { %186 = vmatmul.mubr.bf16.vlgmr.msra.gmra.mrb[0].mxu0 %v56_v19 }
  0x5a   :  { %383 = vmatpush3.bf16.msra.mxu1 %v430_v27 }
 0x12c   :  { %v187_v28 = vpop.f32.mrb[0].mxu0 }
 0x12d   :  { %v349_v29 = vmul.f32 -1.442695, %v187_v28  ;;  %v189_v30 = vpop.f32.mrb[1].mxu0 }
 0x12e   :  { %v191_v31 = vpop.f32.mrb[2].mxu0  ;;  %v350_v38 = vmul.f32 -1.442695, %v189_v30 }
 0x12f   :  { %431 = vpow2.f32 %v349_v29  ;;  %v192_v32 = vpop.f32.mrb[3].mxu0 }
 0x139   :  { %v432_v33 = vpop.eup %431 }
 0x13a   :  { %v200_v34 = vadd.f32 1.0, %v432_v33 }
 0x13c   :  { %433 = vrcp.f32 %v200_v34 }
 0x13d   :  { %435 = vpow2.f32 %v350_v38 }
 0x146   :  { %v434_v35 = vpop.eup %433 }
 0x147   :  { %v206_v36 = vmul.f32 %v434_v35, %v55_v18  ;;  %v436_v39 = vpop.eup %435 }
 0x148   :  { %v201_v40 = vadd.f32 1.0, %v436_v39 }
 0x149   :  { %v207_v37 = vpack.c.bf16 %v206_v36, %v206_v36 }
 0x14a   :  { %437 = vrcp.f32 %v201_v40 }
 0x14b   :  { %385 = vmatmul.mubr.bf16.vlgmr.msra.gmra.mrb[0].mxu1 %v207_v37 }
 0x154   :  { %v438_v45 = vpop.eup %437 }
 0x155   :  { %v313_v47 = vsub.f32 1.0, %v438_v45 }
 0x21e   :  { %v306_v41 = vpop.f32.mrb[0].mxu1 }
 0x21f   :  { %439 = vtanh.f32 %v306_v41  ;;  %v386_v42 = vpop.f32.mrb[1].mxu1 }
 0x220   :  { %v309_v43 = vpop.f32.mrb[2].mxu1 }
 0x221   :  { %v387_v44 = vpop.f32.mrb[3].mxu1 }
 0x229   :  { %v440_v46 = vpop.eup %439 }
 0x22a   :  { %v314_v48 = vsub.f32 %v440_v46, %v55_v18 }
 0x22c   :  { %v315_v49 = vmul.f32 %v314_v48, %v313_v47 }
 0x22e   :  { %316 = vst [vmem:[#allocation8] sm:$0xff] %v315_v49 }
 0x22f   :  { %518 = shalt.err (!%p515_p0)
}
 0x230   :  { %s519_s27 = scalar_lea.hbm %s617_s3, 128 }
 0x231   :  { %p520_p1 = scmp.ne.s32.totalorder %s617_s3, %s519_s27  ;;  %p523_p2 = scmp.lt.u32.totalorder %s519_s27, %s617_s3 }
 0x233   :  { %p525_p3 = pnand %p523_p2, %p520_p1 }
 0x235   :  { %528 = shalt.err (!%p525_p3)
}
 0x236   :  { %326 = dma.vmem_to_hbm [thread:$0]  %s324_s23, 128, %s617_s3, [#allocation4]  }
 0x237   :  { %533 = dma.done.wait [#allocation4], 128  }
 0x238   :  { %534 = vsyncadd [#allocation4], 4294967168 }
 0x239   :  { %330 = vsyncpa [#allocation3], 1 }
 0x23a   :  { %331 = vsyncpa [#allocation6], 1 }
 0x23b   :  { %332 = vsyncpa [#allocation4], 1 }

</bundles_post_ra>
